<compile_context>
chip_gen: v7x
topology: tpu7x:2x2x1
jax: 0.10.0
libtpu: 0.0.40
codegen_flags: <defaults>
</compile_context>

<pallas_src>
import jax
import jax.numpy as jnp
from jax.experimental import pallas as pl
from jax.experimental.pallas import tpu as pltpu

LANE = 128
SUB = 16            # bf16 sublane packing
_NEG_BIG = -1e30    # masks padded logit columns inside the fused log_softmax


def _round_up(x, m):
    return ((x + m - 1) // m) * m


def _pick_tile(m, max_tile, unit, target_steps=2):
    """Tile size (multiple of `unit`, <= max_tile) aiming for >= target_steps
    grid steps when the padded extent allows it. Returns (tile, padded_m)."""
    mu = _round_up(max(m, 1), unit)
    t = _round_up(-(-mu // target_steps), unit)
    t = max(unit, min(max_tile, t))
    return t, _round_up(mu, t)


# ----------------------------- Pallas kernels ------------------------------

def _conv_pool_cm_kernel(p_ref, w_ref, b_ref, o_ref):
    # p: (4, K, tm) bf16 — the 4 pool-shifted im2col views, positions in lanes.
    # w: (OCp, K) bf16, b: (OCp, 1) f32 -> o: (OCp, tm) bf16 (lane-dense).
    # Computes relu(maxpool2x2(conv) + b) == relu(max_d(w @ p[d]) + b).
    w = w_ref[...]
    z0 = jnp.dot(w, p_ref[0], preferred_element_type=jnp.float32)
    z1 = jnp.dot(w, p_ref[1], preferred_element_type=jnp.float32)
    z2 = jnp.dot(w, p_ref[2], preferred_element_type=jnp.float32)
    z3 = jnp.dot(w, p_ref[3], preferred_element_type=jnp.float32)
    z = jnp.maximum(jnp.maximum(z0, z1), jnp.maximum(z2, z3))  # pairwise tree
    z = jnp.maximum(z + b_ref[...], 0.0)
    o_ref[...] = z.astype(o_ref.dtype)


def _mlp_head_kernel(x_ref, w1_ref, b1_ref, w2_ref, b2_ref, w3_ref, b3_ref, o_ref):
    # Fused fc1+ReLU -> fc2+ReLU -> fc3 -> log_softmax, all in VMEM.
    # Matmul operands bf16, accumulation + epilogue f32 (z stays f32: the
    # -1e30 padded-logit bias must never be cast to bf16 before the lse).
    h = jnp.dot(x_ref[...], w1_ref[...], preferred_element_type=jnp.float32)
    h = jnp.maximum(h + b1_ref[...], 0.0)
    h = jnp.dot(h.astype(jnp.bfloat16), w2_ref[...], preferred_element_type=jnp.float32)
    h = jnp.maximum(h + b2_ref[...], 0.0)
    z = jnp.dot(h.astype(jnp.bfloat16), w3_ref[...], preferred_element_type=jnp.float32)
    z = z + b3_ref[...]                      # padded columns carry -1e30 bias
    m = jnp.max(z, axis=-1, keepdims=True)   # m always comes from a real logit
    lse = jnp.log(jnp.sum(jnp.exp(z - m), axis=-1, keepdims=True)) + m
    o_ref[...] = (z - lse).astype(o_ref.dtype)


# ------------------------------ Pallas wrappers -----------------------------

def _conv_pool_cm(p4t, w_t, b_col, *, max_tile):
    """Fused conv(+bias+ReLU)+maxpool2x2, channel-major.

    p4t:   (4, K, M) — 4 pool-shifted im2col views, M = B*Hp*Wp positions.
    w_t:   (OCp, K) bf16 channel-major conv weight (OCp = 16-padded).
    b_col: (OCp, 1) f32.
    Returns (OCp, Mp) bf16, positions lane-dense (caller slices [:OC, :M]).
    """
    _, K, M = p4t.shape
    OCp = w_t.shape[0]
    tm, Mp = _pick_tile(M, max_tile, unit=LANE)
    p = jnp.pad(p4t, ((0, 0), (0, 0), (0, Mp - M))).astype(jnp.bfloat16)

    return pl.pallas_call(
        _conv_pool_cm_kernel,
        out_shape=jax.ShapeDtypeStruct((OCp, Mp), jnp.bfloat16),
        grid_spec=pltpu.PrefetchScalarGridSpec(
            num_scalar_prefetch=0,
            grid=(Mp // tm,),
            in_specs=[
                pl.BlockSpec((4, K, tm), lambda i: (0, 0, i)),
                pl.BlockSpec((OCp, K), lambda i: (0, 0)),
                pl.BlockSpec((OCp, 1), lambda i: (0, 0)),
            ],
            out_specs=pl.BlockSpec((OCp, tm), lambda i: (0, i)),
        ),
        compiler_params=pltpu.CompilerParams(dimension_semantics=("parallel",)),
    )(p, w_t, b_col)


def _mlp_head(x, prep, *, n_out, max_tile=1024):
    """Fused fc1+ReLU / fc2+ReLU / fc3+log_softmax. Returns (M, n_out) f32."""
    M, K = x.shape
    Kp, H1p = prep["fc1w"].shape
    H2p = prep["fc2w"].shape[1]
    NCp = prep["fc3w"].shape[1]
    tm, Mp = _pick_tile(M, max_tile, unit=SUB)
    xp = jnp.pad(x, ((0, Mp - M), (0, Kp - K))).astype(jnp.bfloat16)

    out = pl.pallas_call(
        _mlp_head_kernel,
        out_shape=jax.ShapeDtypeStruct((Mp, NCp), jnp.float32),
        grid_spec=pltpu.PrefetchScalarGridSpec(
            num_scalar_prefetch=0,
            grid=(Mp // tm,),
            in_specs=[
                pl.BlockSpec((tm, Kp), lambda i: (i, 0)),
                pl.BlockSpec((Kp, H1p), lambda i: (0, 0)),
                pl.BlockSpec((1, H1p), lambda i: (0, 0)),
                pl.BlockSpec((H1p, H2p), lambda i: (0, 0)),
                pl.BlockSpec((1, H2p), lambda i: (0, 0)),
                pl.BlockSpec((H2p, NCp), lambda i: (0, 0)),
                pl.BlockSpec((1, NCp), lambda i: (0, 0)),
            ],
            out_specs=pl.BlockSpec((tm, NCp), lambda i: (i, 0)),
        ),
        compiler_params=pltpu.CompilerParams(dimension_semantics=("parallel",)),
    )(xp, prep["fc1w"], prep["fc1b"], prep["fc2w"], prep["fc2b"],
      prep["fc3w"], prep["fc3b"])
    return out[:M, :n_out]


# ------------------------------- Glue (JAX) --------------------------------

def _im2col_pool_cm(x_cbhw, k, pad):
    """im2col + 2x2 pool-split, channel-major.

    x_cbhw: (C, B, H, W) -> (4, C*k*k, B*(Ho//2)*(Wo//2)).  Rows are ordered
    (c, kh, kw) to match torch conv weight.reshape(OC, C*k*k); the leading axis
    holds the 4 members of each 2x2 maxpool window.
    """
    C, B, H, W = x_cbhw.shape
    xp = jnp.pad(x_cbhw, ((0, 0), (0, 0), (pad, pad), (pad, pad)))
    Ho = H + 2 * pad - k + 1
    Wo = W + 2 * pad - k + 1
    assert Ho % 2 == 0 and Wo % 2 == 0, "2x2 maxpool needs even conv output dims"
    rows = []
    for c in range(C):
        for i in range(k):
            for j in range(k):
                rows.append(xp[c, :, i:i + Ho, j:j + Wo])      # (B, Ho, Wo)
    pat = jnp.stack(rows, axis=0)                              # (K, B, Ho, Wo)
    views = [pat[:, :, dh::2, dw::2] for dh in (0, 1) for dw in (0, 1)]
    return jnp.stack(views, axis=0).reshape(4, C * k * k, B * (Ho // 2) * (Wo // 2))


def init_params(key):
    ks = jax.random.split(key, 10)

    def u(k, shape, fan_in):
        bound = 1.0 / jnp.sqrt(fan_in)
        return jax.random.uniform(k, shape, jnp.float32, -bound, bound)

    return {
        "conv1_w": u(ks[0], (6, 1, 3, 3), 1 * 3 * 3),
        "conv1_b": u(ks[1], (6,), 1 * 3 * 3),
        "conv2_w": u(ks[2], (16, 6, 5, 5), 6 * 5 * 5),
        "conv2_b": u(ks[3], (16,), 6 * 5 * 5),
        "fc1_w": u(ks[4], (400, 120), 400),
        "fc1_b": u(ks[5], (120,), 400),
        "fc2_w": u(ks[6], (120, 84), 120),
        "fc2_b": u(ks[7], (84,), 120),
        "fc3_w": u(ks[8], (84, 10), 84),
        "fc3_b": u(ks[9], (10,), 84),
    }


def prepare_params(params):
    """One-time weight prep (run OUTSIDE the traced forward): reshape conv
    weights to channel-major (OC, C*k*k) matrices padded to 16 sublanes, pad
    FC dims to multiples of 128, cast matmul operands to bf16, and bake the
    -1e30 mask into the padded fc3 logit columns."""
    def pad_to(a, shape, value=0.0):
        return jnp.pad(a, [(0, t - s) for s, t in zip(a.shape, shape)],
                       constant_values=value)

    c1 = params["conv1_w"].reshape(6, 9)
    c2 = params["conv2_w"].reshape(16, 150)
    w1, w2, w3 = params["fc1_w"], params["fc2_w"], params["fc3_w"]
    Kp = _round_up(w1.shape[0], LANE)
    H1p = _round_up(w1.shape[1], LANE)
    H2p = _round_up(w2.shape[1], LANE)
    NCp = _round_up(w3.shape[1], LANE)
    oc1 = _round_up(c1.shape[0], SUB)
    oc2 = _round_up(c2.shape[0], SUB)
    return {
        "c1w": pad_to(c1, (oc1, 9)).astype(jnp.bfloat16),
        "c1b": pad_to(params["conv1_b"].astype(jnp.float32), (oc1,)).reshape(oc1, 1),
        "c2w": pad_to(c2, (oc2, 150)).astype(jnp.bfloat16),
        "c2b": pad_to(params["conv2_b"].astype(jnp.float32), (oc2,)).reshape(oc2, 1),
        "fc1w": pad_to(w1, (Kp, H1p)).astype(jnp.bfloat16),
        "fc1b": pad_to(params["fc1_b"].astype(jnp.float32), (H1p,)).reshape(1, H1p),
        "fc2w": pad_to(w2, (H1p, H2p)).astype(jnp.bfloat16),
        "fc2b": pad_to(params["fc2_b"].astype(jnp.float32), (H2p,)).reshape(1, H2p),
        "fc3w": pad_to(w3, (H2p, NCp)).astype(jnp.bfloat16),
        "fc3b": pad_to(params["fc3_b"].astype(jnp.float32), (NCp,),
                       value=_NEG_BIG).reshape(1, NCp),
    }


def lenet_forward(prep, x):
    # x: (B, 1, 28, 28) float32, NCHW
    B = x.shape[0]

    # conv1 (k=3, pad=1) + ReLU + maxpool2 — one fused kernel, channel-major.
    x_cbhw = jnp.transpose(x, (1, 0, 2, 3))                      # (1, B, 28, 28)
    p1 = _im2col_pool_cm(x_cbhw, k=3, pad=1)                     # (4, 9, B*196)
    y1 = _conv_pool_cm(p1, prep["c1w"], prep["c1b"], max_tile=4096)  # (16, Mp1) bf16
    y1 = y1[:6, :B * 14 * 14].reshape(6, B, 14, 14)              # (C2, B, 14, 14)

    # conv2 (k=5, pad=0) + ReLU + maxpool2 — one fused kernel, channel-major.
    p2 = _im2col_pool_cm(y1, k=5, pad=0)                         # (4, 150, B*25)
    y2 = _conv_pool_cm(p2, prep["c2w"], prep["c2b"], max_tile=1024)  # (16, Mp2) bf16

    # dropout1 / dropout2: identity in eval mode.
    # Flatten to torch NCHW order (c, py, px): fc1 weights used unmodified
    # (only a tiny (16, B, 25) transpose, no padded-tensor round trip).
    feat = y2[:16, :B * 25].reshape(16, B, 25).transpose(1, 0, 2).reshape(B, 400)

    # fc1 + ReLU + fc2 + ReLU + fc3 + log_softmax — one fused kernel.
    return _mlp_head(feat, prep, n_out=10)                       # (B, 10) f32 log-probs


# ------------------------- Pure-JAX reference (f32) -------------------------

def lenet_reference(params, x):
    dn = ("NCHW", "OIHW", "NCHW")
    y = jax.lax.conv_general_dilated(x, params["conv1_w"], (1, 1),
                                     ((1, 1), (1, 1)), dimension_numbers=dn)
    y = jax.nn.relu(y + params["conv1_b"][None, :, None, None])
    y = jax.lax.reduce_window(y, -jnp.inf, jax.lax.max, (1, 1, 2, 2), (1, 1, 2, 2), "VALID")
    y = jax.lax.conv_general_dilated(y, params["conv2_w"], (1, 1),
                                     ((0, 0), (0, 0)), dimension_numbers=dn)
    y = jax.nn.relu(y + params["conv2_b"][None, :, None, None])
    y = jax.lax.reduce_window(y, -jnp.inf, jax.lax.max, (1, 1, 2, 2), (1, 1, 2, 2), "VALID")
    f = y.reshape(y.shape[0], -1)
    f = jax.nn.relu(f @ params["fc1_w"] + params["fc1_b"])
    f = jax.nn.relu(f @ params["fc2_w"] + params["fc2_b"])
    z = f @ params["fc3_w"] + params["fc3_b"]
    return jax.nn.log_softmax(z, axis=-1)


if __name__ == "__main__":
    key = jax.random.PRNGKey(0)
    pkey, xkey = jax.random.split(key)
    params = init_params(pkey)
    prep = prepare_params(params)     # one-time weight prep, outside the jit
    # fc1 expects 400 = 16*5*5 features -> input spatial must be 28x28 (MNIST).
    x = jax.random.normal(xkey, (2, 1, 28, 28), jnp.float32)

    out = jax.jit(lenet_forward)(prep, x)
    out = jax.block_until_ready(out)

    assert out.shape == (2, 10)
    # log_softmax rows should sum to ~1 in prob space.
    assert jnp.allclose(jnp.sum(jnp.exp(out), axis=1), 1.0, atol=1e-4)
    # Compare against pure-JAX f32 reference (loose tolerance: bf16 operands).
    ref = jax.jit(lenet_reference)(params, x)
    assert jnp.max(jnp.abs(out - ref)) < 0.2

    print("KERNEL_OK")
</pallas_src>

<mosaic_0001>
module attributes {stable_mosaic.version = 11 : i64} {
  func.func @_conv_pool_cm_kernel(%arg0: i32, %arg1: memref<4x9x256xbf16, #tpu.memory_space<vmem>>, %arg2: memref<16x9xbf16, #tpu.memory_space<vmem>>, %arg3: memref<16x1xf32, #tpu.memory_space<vmem>>, %arg4: memref<16x256xbf16, #tpu.memory_space<vmem>>) attributes {dimension_semantics = [#tpu.dimension_semantics<parallel>], iteration_bounds = array<i64: 2>, scalar_prefetch = 0 : i64, scratch_operands = 0 : i64, tpu.core_type = #tpu.core_type<tc>, window_params = [{transform_indices = @transform_0, window_bounds = array<i64: 4, 9, 256>}, {pipeline_mode = #tpu.pipeline_mode<synchronous>, transform_indices = @transform_1, window_bounds = array<i64: 16, 9>}, {pipeline_mode = #tpu.pipeline_mode<synchronous>, transform_indices = @transform_2, window_bounds = array<i64: 16, 1>}, {transform_indices = @transform_3, window_bounds = array<i64: 16, 256>}]} {
    %c0 = arith.constant 0 : index
    %c0_0 = arith.constant 0 : index
    %0 = vector.load %arg2[%c0, %c0_0] : memref<16x9xbf16, #tpu.memory_space<vmem>>, vector<16x9xbf16>
    %c0_1 = arith.constant 0 : index
    %c0_2 = arith.constant 0 : index
    %c0_3 = arith.constant 0 : index
    %1 = vector.load %arg1[%c0_1, %c0_2, %c0_3] : memref<4x9x256xbf16, #tpu.memory_space<vmem>>, vector<1x9x256xbf16>
    %2 = vector.shape_cast %1 : vector<1x9x256xbf16> to vector<9x256xbf16>
    %cst = arith.constant dense<0.000000e+00> : vector<16x256xf32>
    %3 = tpu.matmul %0, %2, %cst {dimension_numbers = #tpu.dot_dimension_numbers<[1], [0], [0], [1], [0, 0, 1, 1], [], []>} : vector<16x9xbf16>, vector<9x256xbf16>, vector<16x256xf32> -> vector<16x256xf32>
    %c1 = arith.constant 1 : index
    %c0_4 = arith.constant 0 : index
    %c0_5 = arith.constant 0 : index
    %4 = vector.load %arg1[%c1, %c0_4, %c0_5] : memref<4x9x256xbf16, #tpu.memory_space<vmem>>, vector<1x9x256xbf16>
    %5 = vector.shape_cast %4 : vector<1x9x256xbf16> to vector<9x256xbf16>
    %cst_6 = arith.constant dense<0.000000e+00> : vector<16x256xf32>
    %6 = tpu.matmul %0, %5, %cst_6 {dimension_numbers = #tpu.dot_dimension_numbers<[1], [0], [0], [1], [0, 0, 1, 1], [], []>} : vector<16x9xbf16>, vector<9x256xbf16>, vector<16x256xf32> -> vector<16x256xf32>
    %c2 = arith.constant 2 : index
    %c0_7 = arith.constant 0 : index
    %c0_8 = arith.constant 0 : index
    %7 = vector.load %arg1[%c2, %c0_7, %c0_8] : memref<4x9x256xbf16, #tpu.memory_space<vmem>>, vector<1x9x256xbf16>
    %8 = vector.shape_cast %7 : vector<1x9x256xbf16> to vector<9x256xbf16>
    %cst_9 = arith.constant dense<0.000000e+00> : vector<16x256xf32>
    %9 = tpu.matmul %0, %8, %cst_9 {dimension_numbers = #tpu.dot_dimension_numbers<[1], [0], [0], [1], [0, 0, 1, 1], [], []>} : vector<16x9xbf16>, vector<9x256xbf16>, vector<16x256xf32> -> vector<16x256xf32>
    %c3 = arith.constant 3 : index
    %c0_10 = arith.constant 0 : index
    %c0_11 = arith.constant 0 : index
    %10 = vector.load %arg1[%c3, %c0_10, %c0_11] : memref<4x9x256xbf16, #tpu.memory_space<vmem>>, vector<1x9x256xbf16>
    %11 = vector.shape_cast %10 : vector<1x9x256xbf16> to vector<9x256xbf16>
    %cst_12 = arith.constant dense<0.000000e+00> : vector<16x256xf32>
    %12 = tpu.matmul %0, %11, %cst_12 {dimension_numbers = #tpu.dot_dimension_numbers<[1], [0], [0], [1], [0, 0, 1, 1], [], []>} : vector<16x9xbf16>, vector<9x256xbf16>, vector<16x256xf32> -> vector<16x256xf32>
    %13 = arith.maximumf %3, %6 : vector<16x256xf32>
    %14 = arith.maximumf %9, %12 : vector<16x256xf32>
    %15 = arith.maximumf %13, %14 : vector<16x256xf32>
    %c0_13 = arith.constant 0 : index
    %c0_14 = arith.constant 0 : index
    %16 = vector.load %arg3[%c0_13, %c0_14] : memref<16x1xf32, #tpu.memory_space<vmem>>, vector<16x1xf32>
    %17 = vector.broadcast %16 : vector<16x1xf32> to vector<16x256xf32>
    %18 = arith.addf %15, %17 : vector<16x256xf32>
    %cst_15 = arith.constant 0.000000e+00 : f32
    %19 = vector.broadcast %cst_15 : f32 to vector<16x256xf32>
    %20 = arith.maximumf %18, %19 : vector<16x256xf32>
    %21 = arith.truncf %20 : vector<16x256xf32> to vector<16x256xbf16>
    %c0_16 = arith.constant 0 : index
    %c0_17 = arith.constant 0 : index
    %22 = vector.load %arg4[%c0_16, %c0_17] : memref<16x256xbf16, #tpu.memory_space<vmem>>, vector<16x256xbf16>
    tpu.vector_store %arg4[%c0_16, %c0_17], %21 {strides = array<i32>} : memref<16x256xbf16, #tpu.memory_space<vmem>>, vector<16x256xbf16>,
    return
  }
  func.func @transform_0(%arg0: i32) -> (i32, i32, i32) {
    %c0_i32 = arith.constant 0 : i32
    %c0_i32_0 = arith.constant 0 : i32
    %c0_i32_1 = arith.constant 0 : i32
    return %c0_i32, %c0_i32_0, %arg0 : i32, i32, i32
  }
  func.func @transform_1(%arg0: i32) -> (i32, i32) {
    %c0_i32 = arith.constant 0 : i32
    %c0_i32_0 = arith.constant 0 : i32
    %c0_i32_1 = arith.constant 0 : i32
    return %c0_i32, %c0_i32_0 : i32, i32
  }
  func.func @transform_2(%arg0: i32) -> (i32, i32) {
    %c0_i32 = arith.constant 0 : i32
    %c0_i32_0 = arith.constant 0 : i32
    %c0_i32_1 = arith.constant 0 : i32
    return %c0_i32, %c0_i32_0 : i32, i32
  }
  func.func @transform_3(%arg0: i32) -> (i32, i32) {
    %c0_i32 = arith.constant 0 : i32
    %c0_i32_0 = arith.constant 0 : i32
    return %c0_i32, %arg0 : i32, i32
  }
}

module attributes {stable_mosaic.version = 11 : i64} {
  func.func @_conv_pool_cm_kernel(%arg0: i32, %arg1: memref<4x150x128xbf16, #tpu.memory_space<vmem>>, %arg2: memref<16x150xbf16, #tpu.memory_space<vmem>>, %arg3: memref<16x1xf32, #tpu.memory_space<vmem>>, %arg4: memref<16x128xbf16, #tpu.memory_space<vmem>>) attributes {dimension_semantics = [#tpu.dimension_semantics<parallel>], iteration_bounds = array<i64: 1>, scalar_prefetch = 0 : i64, scratch_operands = 0 : i64, tpu.core_type = #tpu.core_type<tc>, window_params = [{transform_indices = @transform_0, window_bounds = array<i64: 4, 150, 128>}, {pipeline_mode = #tpu.pipeline_mode<synchronous>, transform_indices = @transform_1, window_bounds = array<i64: 16, 150>}, {pipeline_mode = #tpu.pipeline_mode<synchronous>, transform_indices = @transform_2, window_bounds = array<i64: 16, 1>}, {transform_indices = @transform_3, window_bounds = array<i64: 16, 128>}]} {
    %c0 = arith.constant 0 : index
    %c0_0 = arith.constant 0 : index
    %0 = vector.load %arg2[%c0, %c0_0] : memref<16x150xbf16, #tpu.memory_space<vmem>>, vector<16x150xbf16>
    %c0_1 = arith.constant 0 : index
    %c0_2 = arith.constant 0 : index
    %c0_3 = arith.constant 0 : index
    %1 = vector.load %arg1[%c0_1, %c0_2, %c0_3] : memref<4x150x128xbf16, #tpu.memory_space<vmem>>, vector<1x150x128xbf16>
    %2 = vector.shape_cast %1 : vector<1x150x128xbf16> to vector<150x128xbf16>
    %cst = arith.constant dense<0.000000e+00> : vector<16x128xf32>
    %3 = tpu.matmul %0, %2, %cst {dimension_numbers = #tpu.dot_dimension_numbers<[1], [0], [0], [1], [0, 0, 1, 1], [], []>} : vector<16x150xbf16>, vector<150x128xbf16>, vector<16x128xf32> -> vector<16x128xf32>
    %c1 = arith.constant 1 : index
    %c0_4 = arith.constant 0 : index
    %c0_5 = arith.constant 0 : index
    %4 = vector.load %arg1[%c1, %c0_4, %c0_5] : memref<4x150x128xbf16, #tpu.memory_space<vmem>>, vector<1x150x128xbf16>
    %5 = vector.shape_cast %4 : vector<1x150x128xbf16> to vector<150x128xbf16>
    %cst_6 = arith.constant dense<0.000000e+00> : vector<16x128xf32>
    %6 = tpu.matmul %0, %5, %cst_6 {dimension_numbers = #tpu.dot_dimension_numbers<[1], [0], [0], [1], [0, 0, 1, 1], [], []>} : vector<16x150xbf16>, vector<150x128xbf16>, vector<16x128xf32> -> vector<16x128xf32>
    %c2 = arith.constant 2 : index
    %c0_7 = arith.constant 0 : index
    %c0_8 = arith.constant 0 : index
    %7 = vector.load %arg1[%c2, %c0_7, %c0_8] : memref<4x150x128xbf16, #tpu.memory_space<vmem>>, vector<1x150x128xbf16>
    %8 = vector.shape_cast %7 : vector<1x150x128xbf16> to vector<150x128xbf16>
    %cst_9 = arith.constant dense<0.000000e+00> : vector<16x128xf32>
    %9 = tpu.matmul %0, %8, %cst_9 {dimension_numbers = #tpu.dot_dimension_numbers<[1], [0], [0], [1], [0, 0, 1, 1], [], []>} : vector<16x150xbf16>, vector<150x128xbf16>, vector<16x128xf32> -> vector<16x128xf32>
    %c3 = arith.constant 3 : index
    %c0_10 = arith.constant 0 : index
    %c0_11 = arith.constant 0 : index
    %10 = vector.load %arg1[%c3, %c0_10, %c0_11] : memref<4x150x128xbf16, #tpu.memory_space<vmem>>, vector<1x150x128xbf16>
    %11 = vector.shape_cast %10 : vector<1x150x128xbf16> to vector<150x128xbf16>
    %cst_12 = arith.constant dense<0.000000e+00> : vector<16x128xf32>
    %12 = tpu.matmul %0, %11, %cst_12 {dimension_numbers = #tpu.dot_dimension_numbers<[1], [0], [0], [1], [0, 0, 1, 1], [], []>} : vector<16x150xbf16>, vector<150x128xbf16>, vector<16x128xf32> -> vector<16x128xf32>
    %13 = arith.maximumf %3, %6 : vector<16x128xf32>
    %14 = arith.maximumf %9, %12 : vector<16x128xf32>
    %15 = arith.maximumf %13, %14 : vector<16x128xf32>
    %c0_13 = arith.constant 0 : index
    %c0_14 = arith.constant 0 : index
    %16 = vector.load %arg3[%c0_13, %c0_14] : memref<16x1xf32, #tpu.memory_space<vmem>>, vector<16x1xf32>
    %17 = vector.broadcast %16 : vector<16x1xf32> to vector<16x128xf32>
    %18 = arith.addf %15, %17 : vector<16x128xf32>
    %cst_15 = arith.constant 0.000000e+00 : f32
    %19 = vector.broadcast %cst_15 : f32 to vector<16x128xf32>
    %20 = arith.maximumf %18, %19 : vector<16x128xf32>
    %21 = arith.truncf %20 : vector<16x128xf32> to vector<16x128xbf16>
    %c0_16 = arith.constant 0 : index
    %c0_17 = arith.constant 0 : index
    %22 = vector.load %arg4[%c0_16, %c0_17] : memref<16x128xbf16, #tpu.memory_space<vmem>>, vector<16x128xbf16>
    tpu.vector_store %arg4[%c0_16, %c0_17], %21 {strides = array<i32>} : memref<16x128xbf16, #tpu.memory_space<vmem>>, vector<16x128xbf16>,
    return
  }
  func.func @transform_0(%arg0: i32) -> (i32, i32, i32) {
    %c0_i32 = arith.constant 0 : i32
    %c0_i32_0 = arith.constant 0 : i32
    %c0_i32_1 = arith.constant 0 : i32
    return %c0_i32, %c0_i32_0, %arg0 : i32, i32, i32
  }
  func.func @transform_1(%arg0: i32) -> (i32, i32) {
    %c0_i32 = arith.constant 0 : i32
    %c0_i32_0 = arith.constant 0 : i32
    %c0_i32_1 = arith.constant 0 : i32
    return %c0_i32, %c0_i32_0 : i32, i32
  }
  func.func @transform_2(%arg0: i32) -> (i32, i32) {
    %c0_i32 = arith.constant 0 : i32
    %c0_i32_0 = arith.constant 0 : i32
    %c0_i32_1 = arith.constant 0 : i32
    return %c0_i32, %c0_i32_0 : i32, i32
  }
  func.func @transform_3(%arg0: i32) -> (i32, i32) {
    %c0_i32 = arith.constant 0 : i32
    %c0_i32_0 = arith.constant 0 : i32
    return %c0_i32, %arg0 : i32, i32
  }
}

module attributes {stable_mosaic.version = 11 : i64} {
  func.func @_mlp_head_kernel(%arg0: i32, %arg1: memref<16x512xbf16, #tpu.memory_space<vmem>>, %arg2: memref<512x128xbf16, #tpu.memory_space<vmem>>, %arg3: memref<1x128xf32, #tpu.memory_space<vmem>>, %arg4: memref<128x128xbf16, #tpu.memory_space<vmem>>, %arg5: memref<1x128xf32, #tpu.memory_space<vmem>>, %arg6: memref<128x128xbf16, #tpu.memory_space<vmem>>, %arg7: memref<1x128xf32, #tpu.memory_space<vmem>>, %arg8: memref<16x128xf32, #tpu.memory_space<vmem>>) attributes {dimension_semantics = [#tpu.dimension_semantics<parallel>], iteration_bounds = array<i64: 1>, scalar_prefetch = 0 : i64, scratch_operands = 0 : i64, tpu.core_type = #tpu.core_type<tc>, window_params = [{transform_indices = @transform_0, window_bounds = array<i64: 16, 512>}, {pipeline_mode = #tpu.pipeline_mode<synchronous>, transform_indices = @transform_1, window_bounds = array<i64: 512, 128>}, {pipeline_mode = #tpu.pipeline_mode<synchronous>, transform_indices = @transform_2, window_bounds = array<i64: 1, 128>}, {pipeline_mode = #tpu.pipeline_mode<synchronous>, transform_indices = @transform_3, window_bounds = array<i64: 128, 128>}, {pipeline_mode = #tpu.pipeline_mode<synchronous>, transform_indices = @transform_4, window_bounds = array<i64: 1, 128>}, {pipeline_mode = #tpu.pipeline_mode<synchronous>, transform_indices = @transform_5, window_bounds = array<i64: 128, 128>}, {pipeline_mode = #tpu.pipeline_mode<synchronous>, transform_indices = @transform_6, window_bounds = array<i64: 1, 128>}, {transform_indices = @transform_7, window_bounds = array<i64: 16, 128>}]} {
    %c0 = arith.constant 0 : index
    %c0_0 = arith.constant 0 : index
    %0 = vector.load %arg1[%c0, %c0_0] : memref<16x512xbf16, #tpu.memory_space<vmem>>, vector<16x512xbf16>
    %c0_1 = arith.constant 0 : index
    %c0_2 = arith.constant 0 : index
    %1 = vector.load %arg2[%c0_1, %c0_2] : memref<512x128xbf16, #tpu.memory_space<vmem>>, vector<512x128xbf16>
    %cst = arith.constant dense<0.000000e+00> : vector<16x128xf32>
    %2 = tpu.matmul %0, %1, %cst {dimension_numbers = #tpu.dot_dimension_numbers<[1], [0], [0], [1], [0, 0, 1, 1], [], []>} : vector<16x512xbf16>, vector<512x128xbf16>, vector<16x128xf32> -> vector<16x128xf32>
    %c0_3 = arith.constant 0 : index
    %c0_4 = arith.constant 0 : index
    %3 = vector.load %arg3[%c0_3, %c0_4] : memref<1x128xf32, #tpu.memory_space<vmem>>, vector<1x128xf32>
    %4 = vector.broadcast %3 : vector<1x128xf32> to vector<16x128xf32>
    %5 = arith.addf %2, %4 : vector<16x128xf32>
    %cst_5 = arith.constant 0.000000e+00 : f32
    %6 = vector.broadcast %cst_5 : f32 to vector<16x128xf32>
    %7 = arith.maximumf %5, %6 : vector<16x128xf32>
    %8 = arith.truncf %7 : vector<16x128xf32> to vector<16x128xbf16>
    %c0_6 = arith.constant 0 : index
    %c0_7 = arith.constant 0 : index
    %9 = vector.load %arg4[%c0_6, %c0_7] : memref<128x128xbf16, #tpu.memory_space<vmem>>, vector<128x128xbf16>
    %cst_8 = arith.constant dense<0.000000e+00> : vector<16x128xf32>
    %10 = tpu.matmul %8, %9, %cst_8 {dimension_numbers = #tpu.dot_dimension_numbers<[1], [0], [0], [1], [0, 0, 1, 1], [], []>} : vector<16x128xbf16>, vector<128x128xbf16>, vector<16x128xf32> -> vector<16x128xf32>
    %c0_9 = arith.constant 0 : index
    %c0_10 = arith.constant 0 : index
    %11 = vector.load %arg5[%c0_9, %c0_10] : memref<1x128xf32, #tpu.memory_space<vmem>>, vector<1x128xf32>
    %12 = vector.broadcast %11 : vector<1x128xf32> to vector<16x128xf32>
    %13 = arith.addf %10, %12 : vector<16x128xf32>
    %cst_11 = arith.constant 0.000000e+00 : f32
    %14 = vector.broadcast %cst_11 : f32 to vector<16x128xf32>
    %15 = arith.maximumf %13, %14 : vector<16x128xf32>
    %16 = arith.truncf %15 : vector<16x128xf32> to vector<16x128xbf16>
    %c0_12 = arith.constant 0 : index
    %c0_13 = arith.constant 0 : index
    %17 = vector.load %arg6[%c0_12, %c0_13] : memref<128x128xbf16, #tpu.memory_space<vmem>>, vector<128x128xbf16>
    %cst_14 = arith.constant dense<0.000000e+00> : vector<16x128xf32>
    %18 = tpu.matmul %16, %17, %cst_14 {dimension_numbers = #tpu.dot_dimension_numbers<[1], [0], [0], [1], [0, 0, 1, 1], [], []>} : vector<16x128xbf16>, vector<128x128xbf16>, vector<16x128xf32> -> vector<16x128xf32>
    %c0_15 = arith.constant 0 : index
    %c0_16 = arith.constant 0 : index
    %19 = vector.load %arg7[%c0_15, %c0_16] : memref<1x128xf32, #tpu.memory_space<vmem>>, vector<1x128xf32>
    %20 = vector.broadcast %19 : vector<1x128xf32> to vector<16x128xf32>
    %21 = arith.addf %18, %20 : vector<16x128xf32>
    %cst_17 = arith.constant dense<0xFF800000> : vector<16xf32>
    %22 = vector.multi_reduction <maximumf>, %21, %cst_17 [1] : vector<16x128xf32> to vector<16xf32>
    %23 = vector.shape_cast %22 : vector<16xf32> to vector<16x1xf32>
    %24 = vector.broadcast %23 : vector<16x1xf32> to vector<16x128xf32>
    %25 = arith.subf %21, %24 : vector<16x128xf32>
    %26 = math.exp %25 : vector<16x128xf32>
    %cst_18 = arith.constant dense<0.000000e+00> : vector<16xf32>
    %27 = vector.multi_reduction <add>, %26, %cst_18 [1] : vector<16x128xf32> to vector<16xf32>
    %28 = vector.shape_cast %27 : vector<16xf32> to vector<16x1xf32>
    %29 = math.log %28 : vector<16x1xf32>
    %30 = arith.addf %29, %23 : vector<16x1xf32>
    %31 = vector.broadcast %30 : vector<16x1xf32> to vector<16x128xf32>
    %32 = arith.subf %21, %31 : vector<16x128xf32>
    %c0_19 = arith.constant 0 : index
    %c0_20 = arith.constant 0 : index
    %33 = vector.load %arg8[%c0_19, %c0_20] : memref<16x128xf32, #tpu.memory_space<vmem>>, vector<16x128xf32>
    tpu.vector_store %arg8[%c0_19, %c0_20], %32 {strides = array<i32>} : memref<16x128xf32, #tpu.memory_space<vmem>>, vector<16x128xf32>,
    return
  }
  func.func @transform_0(%arg0: i32) -> (i32, i32) {
    %c0_i32 = arith.constant 0 : i32
    %c0_i32_0 = arith.constant 0 : i32
    return %arg0, %c0_i32 : i32, i32
  }
  func.func @transform_1(%arg0: i32) -> (i32, i32) {
    %c0_i32 = arith.constant 0 : i32
    %c0_i32_0 = arith.constant 0 : i32
    %c0_i32_1 = arith.constant 0 : i32
    return %c0_i32, %c0_i32_0 : i32, i32
  }
  func.func @transform_2(%arg0: i32) -> (i32, i32) {
    %c0_i32 = arith.constant 0 : i32
    %c0_i32_0 = arith.constant 0 : i32
    %c0_i32_1 = arith.constant 0 : i32
    return %c0_i32, %c0_i32_0 : i32, i32
  }
  func.func @transform_3(%arg0: i32) -> (i32, i32) {
    %c0_i32 = arith.constant 0 : i32
    %c0_i32_0 = arith.constant 0 : i32
    %c0_i32_1 = arith.constant 0 : i32
    return %c0_i32, %c0_i32_0 : i32, i32
  }
  func.func @transform_4(%arg0: i32) -> (i32, i32) {
    %c0_i32 = arith.constant 0 : i32
    %c0_i32_0 = arith.constant 0 : i32
    %c0_i32_1 = arith.constant 0 : i32
    return %c0_i32, %c0_i32_0 : i32, i32
  }
  func.func @transform_5(%arg0: i32) -> (i32, i32) {
    %c0_i32 = arith.constant 0 : i32
    %c0_i32_0 = arith.constant 0 : i32
    %c0_i32_1 = arith.constant 0 : i32
    return %c0_i32, %c0_i32_0 : i32, i32
  }
  func.func @transform_6(%arg0: i32) -> (i32, i32) {
    %c0_i32 = arith.constant 0 : i32
    %c0_i32_0 = arith.constant 0 : i32
    %c0_i32_1 = arith.constant 0 : i32
    return %c0_i32, %c0_i32_0 : i32, i32
  }
  func.func @transform_7(%arg0: i32) -> (i32, i32) {
    %c0_i32 = arith.constant 0 : i32
    %c0_i32_0 = arith.constant 0 : i32
    return %arg0, %c0_i32 : i32, i32
  }
}

</mosaic_0001>

<bundles_post_ra>
// kernel: lenet_forward.3
= control target key start
LH: loop header
LB: loop body
LE: loop exit
PB: predicated region body
PF: predicated region fallthrough
CT: control target
= control target key end

     0   :  { %s759_s12 = smov 0   ;;  %s761_s13 = smov 0   ;;  %s832_s0 = inlined_call_operand.vmem [shape: bf16[4,9,512], index: 0, kind: input, shape index: {}]   ;;  %s833_s1 = inlined_call_operand.vmem [shape: bf16[16,9], index: 1, kind: input, shape index: {}]   ;;  %s834_s2 = inlined_call_operand.vmem [shape: f32[16,1], index: 2, kind: input, shape index: {}]   ;;  %s835_s3 = inlined_call_operand.vmem [shape: bf16[16,512], index: 3, kind: output, shape index: {}]  }
   0x1   :  { %s763_s14 = smov 0  }
   0x2 LB: > { %s633_s15 = sadd.s32 4294967295, %s735_s14   ;;  %s776_s16 = sadd.s32 1, %s735_s14   ;;  %s735_s14 = sphi %s763_s14, %s839_s14   ;;  %s731_s13 = sphi %s761_s13, %s838_s13   ;;  %s727_s12 = sphi %s759_s12, %s837_s12  }
   0x3   : > { %s17_s17 = ssub.s32 %s735_s14, %s776_s16  ;;  %s20_s18 = sadd.s32 1, %s731_s13 }
   0x4   : > { %p18_p0 = scmp.eq.s32.totalorder %s17_s17, 0  ;;  %p27_p1 = scmp.ne.s32.totalorder %s731_s13, %s727_s12 }
   0x5   : > { %p28_p2 = scmp.eq.s32.totalorder %s735_s14, 0  ;;  %p99_p3 = scmp.eq.s32.totalorder %s633_s15, 1 }
   0x6   : > { %s787_s19 = scalar_select %p18_p0, %s731_s13, %s20_s18  }
   0x7   : > { %p29_p4 = por %p28_p2, %p27_p1  ;;  %p789_p5 = por %p99_p3, %p27_p1 }
   0x8   : > { %p636_p6 = scmp.ge.s32.totalorder %s735_s14, 2 }
   0xa   : > { %127 = sbr.rel (%p636_p6) target bundleno = 25 (0x19), region = 24 }
  0x11   : > { %130 = sbr.rel (!%p29_p4) target bundleno = 25 (0x19), region = 28  ;;  %s132_s21 = sand.u32 (%p29_p4), 1, %s731_s13  }
  0x12   : > { %s669_s22 = sshll.u32 (%p29_p4), %s735_s14, 3  ;;  %s637_s23 = sshll.u32 (%p29_p4), %s132_s21, 6 }
  0x13   : > { %s137_s26 = scalar_lea.vmem (%p29_p4), %s832_s0, %s669_s22  ;;  %s134_s27 = scalar_lea.vmem (%p29_p4), [#allocation2], %s637_s23 }
  0x14   : > { %v179_v0 = vld [vmem:[%s137_s26] sm:$0xff] (%p29_p4)  ;;  %v181_v1 = vld [vmem:[%s137_s26 + $0x10] sm:$0xff] (%p29_p4) }
  0x15   : > { %v183_v2 = vld [vmem:[%s137_s26 + $0x20] sm:$0xff] (%p29_p4)  ;;  %180 = vst [vmem:[%s134_s27] sm:$0xff] (%p29_p4), %v179_v0  ;;  %182 = vst [vmem:[%s134_s27 + $0x8] sm:$0xff] (%p29_p4), %v181_v1  ;;  %v185_v3 = vld [vmem:[%s137_s26 + $0x30] sm:$0xff] (%p29_p4) }
  0x16   : > { %184 = vst [vmem:[%s134_s27 + $0x10] sm:$0xff] (%p29_p4), %v183_v2  ;;  %v187_v4 = vld [vmem:[%s137_s26 + $0x40] sm:$0xff] (%p29_p4)  ;;  %v189_v5 = vld [vmem:[%s137_s26 + $0x50] sm:$0xff] (%p29_p4)  ;;  %186 = vst [vmem:[%s134_s27 + $0x18] sm:$0xff] (%p29_p4), %v185_v3 }
  0x17   : > { %188 = vst [vmem:[%s134_s27 + $0x20] sm:$0xff] (%p29_p4), %v187_v4  ;;  %190 = vst [vmem:[%s134_s27 + $0x28] sm:$0xff] (%p29_p4), %v189_v5  ;;  %v191_v6 = vld [vmem:[%s137_s26 + $0x60] sm:$0xff] (%p29_p4)  ;;  %v193_v7 = vld [vmem:[%s137_s26 + $0x70] sm:$0xff] (%p29_p4) }
  0x18   : > { %192 = vst [vmem:[%s134_s27 + $0x30] sm:$0xff] %v191_v6  ;;  %194 = vst [vmem:[%s134_s27 + $0x38] sm:$0xff] %v193_v7 }
  0x19 PF: > { %p640_p7 = scmp.ge.s32.totalorder %s735_s14, 1  ;;  %p199_p8 = scmp.lt.s32.totalorder %s735_s14, 3 }
  0x1b   : > { %p200_p9 = pnand %p640_p7, %p199_p8 }
  0x1c   : > { %s206_s28 = sand.u32 (!%p200_p9), 1, %s727_s12   ;;  %vm252_vm0 = vcmask (!%p200_p9), 1043456   ;;  %vm253_vm1 = vcmask (!%p200_p9), 1044480   ;;  %v737_v8 = vmov (!%p200_p9), 65535   ;;  %v738_v10 = vmov (!%p200_p9), 0   ;;  %v497_v12 = vld [vmem:[%s834_s2] sm:$0xff] (!%p200_p9) }
  0x1d   : > { %203 = sbr.rel (%p200_p9) target bundleno = 281 (0x119), region = 66  ;;  %s641_s29 = sshll.u32 (!%p200_p9), %s206_s28, 6  ;;  %v254_v9 = vsel (!%p200_p9), %vm252_vm0, 4294967295, %v737_v8  ;;  %294 = vmatprep.mubr.bf16.mxu0 (!%p200_p9), %v738_v10  ;;  %354 = vmatprep.mubr.bf16.mxu1 (!%p200_p9), %v738_v10  ;;  %v498_v13 = vld [vmem:[%s834_s2 + $0x8] sm:$0xff] (!%p200_p9)  ;;  %v706_v20 = vld [vmem:[%s833_s1] sm:$0xff] (!%p200_p9)   ;;  %vm248_vm2 = vcmask (!%p200_p9), 72704  }
  0x1e   : > { %v255_v11 = vsel (!%p200_p9), %vm253_vm1, %v254_v9, 0  ;;  %699 = vset.pattern.permute.xlu0 (!%p200_p9), %v738_v10  ;;  %s208_s7 = scalar_lea.vmem (!%p200_p9), [#allocation2], %s641_s29  ;;  %s642_s10 = sshll.u32 (!%p200_p9), %s206_s28, 4 }
  0x1f   : > { %v700_v14 = vld [vmem:[%s208_s7 + $0x4] ss:$8 sps:$4 sm:$0x1f] (!%p200_p9)   ;;  %501 = vperm.xlu0 (!%p200_p9), %699, %v497_v12   ;;  %v702_v15 = vld [vmem:[%s208_s7 + $0x14] ss:$8 sps:$4 sm:$0x1f] (!%p200_p9)  }
  0x20   : > { %v260_v16 = vand.u32 (!%p200_p9), %v700_v14, %v255_v11  ;;  %v704_v17 = vld [vmem:[%s208_s7] ss:$8 sps:$4 sm:$0x1f] (!%p200_p9)   ;;  %v705_v18 = vld [vmem:[%s208_s7 + $0x10] ss:$8 sps:$4 sm:$0x1f] (!%p200_p9)   ;;  %v320_v19 = vand.u32 (!%p200_p9), %v702_v15, %v255_v11 }
  0x21   : > { %v707_v21 = vld [vmem:[%s208_s7 + $0x20] ss:$8 sps:$4 sm:$0x1f] (!%p200_p9)   ;;  %v257_v22 = vand.u32 (!%p200_p9), %v704_v17, %v255_v11  ;;  %v317_v23 = vand.u32 (!%p200_p9), %v705_v18, %v255_v11  ;;  %v709_v24 = vld [vmem:[%s208_s7 + $0x24] ss:$8 sps:$4 sm:$0x1f] (!%p200_p9)  }
  0x22   : > { %262 = vmatprep.subr.bf16.mxu0 (!%p200_p9), %v260_v16  ;;  %322 = vmatprep.subr.bf16.mxu1 (!%p200_p9), %v320_v19  ;;  %v710_v25 = vld [vmem:[%s208_s7 + $0x30] ss:$8 sps:$4 sm:$0x1f] (!%p200_p9)   ;;  %v712_v26 = vld [vmem:[%s208_s7 + $0x34] ss:$8 sps:$4 sm:$0x1f] (!%p200_p9)   ;;  %v380_v27 = vand.u32 (!%p200_p9), %v709_v24, %v255_v11  ;;  %v377_v28 = vand.u32 (!%p200_p9), %v707_v21, %v255_v11 }
  0x23   : > { %506 = vperm.xlu0 (!%p200_p9), %699, %v498_v13   ;;  %263 = vmatpush1.bf16.msra.mxu0 (!%p200_p9), %v257_v22  ;;  %v440_v29 = vand.u32 (!%p200_p9), %v712_v26, %v255_v11  ;;  %v437_v30 = vand.u32 (!%p200_p9), %v710_v25, %v255_v11  ;;  %s227_s11 = scalar_lea.vmem (!%p200_p9), [#allocation3], %s642_s10 }
  0x24   : > { %323 = vmatpush1.bf16.msra.mxu1 %v317_v23  ;;  %382 = vmatprep.subr.bf16.mxu0 %v380_v27  ;;  %s672_s17 = sshll.u32 (%p789_p5), %s633_s15, 3 }
  0x25   : > { %442 = vmatprep.subr.bf16.mxu1 %v440_v29  ;;  %s540_s21 = scalar_lea.vmem (%p789_p5), %s835_s3, %s672_s17 }
  0x26   : > { %646 = vmatmul.mubr.msk.bf16.vlgmr.msra.gmra.mrb[0].mxu0 %vm248_vm2, %v706_v20 }
  0x27   : > { %651 = vmatmul.mubr.msk.bf16.vlgmr.msra.gmra.mrb[0].mxu1 %vm248_vm2, %v706_v20  ;;  %383 = vmatpush1.bf16.msra.mxu0 %v377_v28 }
  0x28   : > { %443 = vmatpush1.bf16.msra.mxu1 %v437_v30  ;;  %414 = vmatprep.mubr.bf16.mxu0 %v738_v10 }
  0x29   : > { %474 = vmatprep.mubr.bf16.mxu1 %v738_v10 }
  0x2e   : > { %656 = vmatmul.mubr.msk.bf16.vlgmr.msra.gmra.mrb[4].mxu0 %vm248_vm2, %v706_v20 }
  0x2f   : > { %661 = vmatmul.mubr.msk.bf16.vlgmr.msra.gmra.mrb[4].mxu1 %vm248_vm2, %v706_v20 }
  0x9e   : > { %v502_v43 = vpop.permute.xlu0 %501 }
  0xa2   : > { %v507_v61 = vpop.permute.xlu0 %506 }
  0xf9   : > { %v296_v31 = vpop.f32.mrb[0].mxu0 }
  0xfa   : > { %v356_v32 = vpop.f32.mrb[0].mxu1  ;;  %v298_v34 = vpop.f32.mrb[1].mxu0 }
  0xfb   : > { %v485_v33 = vmax.f32 %v296_v31, %v356_v32  ;;  %v358_v35 = vpop.f32.mrb[1].mxu1  ;;  %v300_v37 = vpop.f32.mrb[2].mxu0 }
  0xfc   : > { %v486_v36 = vmax.f32 %v298_v34, %v358_v35  ;;  %v360_v38 = vpop.f32.mrb[2].mxu1  ;;  %v302_v40 = vpop.f32.mrb[3].mxu0 }
  0xfd   : > { %v487_v39 = vmax.f32 %v300_v37, %v360_v38  ;;  %v362_v41 = vpop.f32.mrb[3].mxu1 }
  0xfe   : > { %v488_v42 = vmax.f32 %v302_v40, %v362_v41 }
 0x101   : > { %v416_v44 = vpop.f32.mrb[4].mxu0 }
 0x102   : > { %v476_v45 = vpop.f32.mrb[4].mxu1  ;;  %v418_v47 = vpop.f32.mrb[5].mxu0 }
 0x103   : > { %v489_v46 = vmax.f32 %v416_v44, %v476_v45  ;;  %v478_v48 = vpop.f32.mrb[5].mxu1  ;;  %v420_v50 = vpop.f32.mrb[6].mxu0 }
 0x104   : > { %v490_v49 = vmax.f32 %v418_v47, %v478_v48  ;;  %v480_v51 = vpop.f32.mrb[6].mxu1  ;;  %v422_v54 = vpop.f32.mrb[7].mxu0 }
 0x105   : > { %v493_v52 = vmax.f32 %v485_v33, %v489_v46  ;;  %v491_v53 = vmax.f32 %v420_v50, %v480_v51  ;;  %v482_v55 = vpop.f32.mrb[7].mxu1 }
 0x106   : > { %v494_v56 = vmax.f32 %v486_v36, %v490_v49  ;;  %v492_v57 = vmax.f32 %v422_v54, %v482_v55 }
 0x107   : > { %v509_v58 = vadd.f32 %v502_v43, %v493_v52  ;;  %v495_v59 = vmax.f32 %v487_v39, %v491_v53 }
 0x108   : > { %v510_v60 = vadd.f32 %v502_v43, %v494_v56  ;;  %v496_v62 = vmax.f32 %v488_v42, %v492_v57 }
 0x109   : > { %v513_v63 = vmax.f32 %v509_v58, 0.0  ;;  %v511_v0 = vadd.f32 %v507_v61, %v495_v59 }
 0x10a   : > { %v514_v1 = vmax.f32 %v510_v60, 0.0  ;;  %v512_v2 = vadd.f32 %v507_v61, %v496_v62  ;;  %537 = sbr.rel (!%p789_p5) target bundleno = 281 (0x119), region = 74 }
 0x10b   : > { %v515_v3 = vmax.f32 %v511_v0, 0.0 }
 0x10c   : > { %v670_v4 = vpack.c.bf16 %v514_v1, %v513_v63  ;;  %v516_v5 = vmax.f32 %v512_v2, 0.0 }
 0x10e   : > { %v671_v6 = vpack.c.bf16 %v516_v5, %v515_v3  ;;  %529 = vst [vmem:[%s227_s11] sm:$0xff] %v670_v4 }
 0x110   : > { %530 = vst [vmem:[%s227_s11 + $0x8] sm:$0xff] %v671_v6 }
 0x115   : > { %v570_v7 = vld [vmem:[%s227_s11] sm:$0xff] }
 0x116   : > { %571 = vst [vmem:[%s540_s21] sm:$0xff] %v570_v7 }
 0x117   : > { %v572_v8 = vld [vmem:[%s227_s11 + $0x8] sm:$0xff] }
 0x118   : > { %573 = vst [vmem:[%s540_s21 + $0x10] sm:$0xff] %v572_v8 }
 0x119 PF: > { %p10_p10 = scmp.ge.s32.totalorder %s776_s16, 4   ;;  %s837_s12 = smov %s731_s13 }
 0x11a   : > { %s838_s13 = smov %s787_s19  ;;  %s839_s14 = smov %s776_s16 }
 0x11b   :  { %12 = sbr.rel (!%p10_p10) target bundleno = 2 (0x2), region = 146 }

// kernel: lenet_forward.4
= control target key start
LH: loop header
LB: loop body
LE: loop exit
PB: predicated region body
PF: predicated region fallthrough
CT: control target
= control target key end

     0   :  { %v707_v0 = vmov 0   ;;  %vm102_vm0 = vcmask 179200   ;;  %vm106_vm1 = vcmask 1042432   ;;  %s918_s0 = inlined_call_operand.vmem [shape: bf16[4,150,128], index: 0, kind: input, shape index: {}]   ;;  %s919_s1 = inlined_call_operand.vmem [shape: bf16[16,150], index: 1, kind: input, shape index: {}]   ;;  %s920_s2 = inlined_call_operand.vmem [shape: f32[16,1], index: 2, kind: input, shape index: {}]   ;;  %s921_s3 = inlined_call_operand.vmem [shape: bf16[16,128], index: 3, kind: output, shape index: {}]  }
   0x1   :  { %110 = vmatprep.subr.bf16.mxu0 %v707_v0  ;;  %231 = vmatprep.subr.bf16.mxu1 %v707_v0  ;;  %v664_v1 = vld [vmem:[%s918_s0] sm:$0xff]   ;;  %v665_v2 = vld [vmem:[%s918_s0 + $0x4c] sm:$0xff]   ;;  %v667_v4 = vld [vmem:[%s918_s0 + $0x54] sm:$0xff]  }
   0x2   :  { %663 = vset.pattern.permute.xlu0 %v707_v0  ;;  %111 = vmatpush1.bf16.msra.mxu0 %v664_v1  ;;  %v666_v3 = vld [vmem:[%s918_s0 + $0x8] sm:$0xff]   ;;  %v668_v5 = vld [vmem:[%s918_s0 + $0x10] sm:$0xff]   ;;  %v669_v6 = vld [vmem:[%s918_s0 + $0x5c] sm:$0xff]  }
   0x3   :  { %232 = vmatpush1.bf16.msra.mxu1 %v665_v2  ;;  %112 = vmatprep.subr.bf16.mxu0 %v707_v0  ;;  %v670_v7 = vld [vmem:[%s918_s0 + $0x18] sm:$0xff]   ;;  %v671_v8 = vld [vmem:[%s918_s0 + $0x64] sm:$0xff]   ;;  %v673_v10 = vld [vmem:[%s918_s0 + $0x6c] sm:$0xff]  }
   0x4   :  { %233 = vmatprep.subr.bf16.mxu1 %v707_v0  ;;  %v672_v9 = vld [vmem:[%s918_s0 + $0x20] sm:$0xff]   ;;  %v674_v11 = vld [vmem:[%s918_s0 + $0x28] sm:$0xff]   ;;  %v675_v12 = vld [vmem:[%s918_s0 + $0x74] sm:$0xff]  }
   0x5   :  { %v684_v13 = vld [vmem:[%s919_s1 + $0x4] ss:$8 sps:$4 sm:$0xff]   ;;  %v676_v14 = vld [vmem:[%s918_s0 + $0x30] sm:$0xff]   ;;  %v677_v15 = vld [vmem:[%s918_s0 + $0x7c] sm:$0xff]  }
   0x6   :  { %113 = vmatpush1.bf16.msra.mxu0 %v666_v3  ;;  %562 = vmatprep.mubr.msk.bf16.mxu0 %vm102_vm0, %v684_v13  ;;  %v678_v16 = vld [vmem:[%s918_s0 + $0x38] sm:$0xff]   ;;  %v679_v17 = vld [vmem:[%s918_s0 + $0x84] sm:$0xff]   ;;  %v683_v20 = vld [vmem:[%s918_s0 + $0x94] ss:$0 sps:$4 sm:$0x77]  }
   0x7   :  { %234 = vmatpush1.bf16.msra.mxu1 %v667_v4  ;;  %114 = vmatprep.subr.bf16.mxu0 %v707_v0  ;;  %v682_v18 = vld [vmem:[%s918_s0 + $0x48] ss:$0 sps:$4 sm:$0x77]   ;;  %v680_v19 = vld [vmem:[%s918_s0 + $0x40] sm:$0xff]   ;;  %v681_v21 = vld [vmem:[%s918_s0 + $0x8c] sm:$0xff]   ;;  %v229_v23 = vsel %vm106_vm1, %v683_v20, 0 }
   0x8   :  { %235 = vmatprep.subr.bf16.mxu1 %v707_v0  ;;  %592 = vmatprep.mubr.msk.bf16.mxu1 %vm102_vm0, %v684_v13  ;;  %v108_v22 = vsel %vm106_vm1, %v682_v18, 0  ;;  %v819_v24 = vld [vmem:[%s919_s1] ss:$8 sps:$4 sm:$0xff]   ;;  %v687_v25 = vld [vmem:[%s918_s0 + $0x98] sm:$0xff]   ;;  %v690_v30 = vld [vmem:[%s918_s0 + $0xec] sm:$0xff]  }
   0x9   :  { %v688_v26 = vld [vmem:[%s918_s0 + $0xe4] sm:$0xff]   ;;  %v692_v32 = vld [vmem:[%s918_s0 + $0xf4] sm:$0xff]   ;;  %v694_v34 = vld [vmem:[%s918_s0 + $0xfc] sm:$0xff]  }
   0xa   :  { %115 = vmatpush1.bf16.msra.mxu0 %v668_v5  ;;  %v520_v27 = vld [vmem:[%s920_s2] sm:$0xff]  ;;  %v521_v29 = vld [vmem:[%s920_s2 + $0x8] sm:$0xff]  ;;  %v693_v33 = vld [vmem:[%s918_s0 + $0xb0] sm:$0xff]  }
   0xb   :  { %236 = vmatpush1.bf16.msra.mxu1 %v669_v6  ;;  %116 = vmatprep.subr.bf16.mxu0 %v707_v0  ;;  %v689_v28 = vld [vmem:[%s918_s0 + $0xa0] sm:$0xff]   ;;  %v691_v31 = vld [vmem:[%s918_s0 + $0xa8] sm:$0xff]   ;;  %v695_v35 = vld [vmem:[%s918_s0 + $0xb8] sm:$0xff]  }
   0xc   :  { %237 = vmatprep.subr.bf16.mxu1 %v707_v0  ;;  %524 = vperm.xlu0 %663, %v520_v27   ;;  %v696_v36 = vld [vmem:[%s918_s0 + $0x104] sm:$0xff]   ;;  %v698_v38 = vld [vmem:[%s918_s0 + $0x10c] sm:$0xff]   ;;  %v700_v40 = vld [vmem:[%s918_s0 + $0x114] sm:$0xff]  }
   0xd   :  { %v697_v37 = vld [vmem:[%s918_s0 + $0xc0] sm:$0xff]   ;;  %v699_v39 = vld [vmem:[%s918_s0 + $0xc8] sm:$0xff]   ;;  %v701_v41 = vld [vmem:[%s918_s0 + $0xd0] sm:$0xff]  }
   0xe   :  { %117 = vmatpush1.bf16.msra.mxu0 %v670_v7  ;;  %v702_v42 = vld [vmem:[%s918_s0 + $0x11c] sm:$0xff]   ;;  %v704_v44 = vld [vmem:[%s918_s0 + $0x124] sm:$0xff]   ;;  %v706_v46 = vld [vmem:[%s918_s0 + $0x12c] ss:$0 sps:$4 sm:$0x77]  }
   0xf   :  { %238 = vmatpush1.bf16.msra.mxu1 %v671_v8  ;;  %118 = vmatprep.subr.bf16.mxu0 %v707_v0  ;;  %v703_v43 = vld [vmem:[%s918_s0 + $0xd8] sm:$0xff]   ;;  %v705_v45 = vld [vmem:[%s918_s0 + $0xe0] ss:$0 sps:$4 sm:$0x77]   ;;  %v471_v48 = vsel %vm106_vm1, %v706_v46, 0 }
  0x10   :  { %239 = vmatprep.subr.bf16.mxu1 %v707_v0  ;;  %529 = vperm.xlu0 %663, %v521_v29   ;;  %v350_v47 = vsel %vm106_vm1, %v705_v45, 0 }
  0x12   :  { %119 = vmatpush1.bf16.msra.mxu0 %v672_v9 }
  0x13   :  { %240 = vmatpush1.bf16.msra.mxu1 %v673_v10  ;;  %120 = vmatprep.subr.bf16.mxu0 %v707_v0 }
  0x14   :  { %241 = vmatprep.subr.bf16.mxu1 %v707_v0 }
  0x16   :  { %121 = vmatpush1.bf16.msra.mxu0 %v674_v11 }
  0x17   :  { %242 = vmatpush1.bf16.msra.mxu1 %v675_v12  ;;  %122 = vmatprep.subr.bf16.mxu0 %v707_v0 }
  0x18   :  { %243 = vmatprep.subr.bf16.mxu1 %v707_v0 }
  0x1a   :  { %123 = vmatpush1.bf16.msra.mxu0 %v676_v14 }
  0x1b   :  { %244 = vmatpush1.bf16.msra.mxu1 %v677_v15  ;;  %124 = vmatprep.subr.bf16.mxu0 %v707_v0 }
  0x1c   :  { %245 = vmatprep.subr.bf16.mxu1 %v707_v0 }
  0x1e   :  { %125 = vmatpush1.bf16.msra.mxu0 %v678_v16 }
  0x1f   :  { %246 = vmatpush1.bf16.msra.mxu1 %v679_v17  ;;  %126 = vmatprep.subr.bf16.mxu0 %v707_v0 }
  0x20   :  { %247 = vmatprep.subr.bf16.mxu1 %v707_v0 }
  0x22   :  { %127 = vmatpush1.bf16.msra.mxu0 %v680_v19 }
  0x23   :  { %248 = vmatpush1.bf16.msra.mxu1 %v681_v21  ;;  %128 = vmatprep.subr.bf16.mxu0 %v707_v0 }
  0x24   :  { %249 = vmatprep.subr.bf16.mxu1 %v707_v0 }
  0x26   :  { %129 = vmatpush1.bf16.msra.mxu0 %v108_v22 }
  0x27   :  { %250 = vmatpush1.bf16.msra.mxu1 %v229_v23  ;;  %352 = vmatprep.subr.bf16.mxu0 %v707_v0 }
  0x28   :  { %473 = vmatprep.subr.bf16.mxu1 %v707_v0 }
  0x29   :  { %143 = vmatmul.mubr.bf16.vlgmr.msra.gmra.mrb[0].mxu0 %v819_v24 }
  0x2a   :  { %264 = vmatmul.mubr.bf16.vlgmr.msra.gmra.mrb[0].mxu1 %v819_v24  ;;  %353 = vmatpush1.bf16.msra.mxu0 %v687_v25 }
  0x2b   :  { %474 = vmatpush1.bf16.msra.mxu1 %v688_v26  ;;  %354 = vmatprep.subr.bf16.mxu0 %v707_v0 }
  0x2c   :  { %475 = vmatprep.subr.bf16.mxu1 %v707_v0  ;;  %622 = vmatprep.mubr.msk.bf16.mxu0 %vm102_vm0, %v684_v13 }
  0x2d   :  { %652 = vmatprep.mubr.msk.bf16.mxu1 %vm102_vm0, %v684_v13 }
  0x2e   :  { %355 = vmatpush1.bf16.msra.mxu0 %v689_v28 }
  0x2f   :  { %476 = vmatpush1.bf16.msra.mxu1 %v690_v30  ;;  %356 = vmatprep.subr.bf16.mxu0 %v707_v0 }
  0x30   :  { %477 = vmatprep.subr.bf16.mxu1 %v707_v0 }
  0x32   :  { %357 = vmatpush1.bf16.msra.mxu0 %v691_v31 }
  0x33   :  { %478 = vmatpush1.bf16.msra.mxu1 %v692_v32  ;;  %358 = vmatprep.subr.bf16.mxu0 %v707_v0 }
  0x34   :  { %479 = vmatprep.subr.bf16.mxu1 %v707_v0 }
  0x36   :  { %359 = vmatpush1.bf16.msra.mxu0 %v693_v33 }
  0x37   :  { %480 = vmatpush1.bf16.msra.mxu1 %v694_v34  ;;  %360 = vmatprep.subr.bf16.mxu0 %v707_v0 }
  0x38   :  { %481 = vmatprep.subr.bf16.mxu1 %v707_v0 }
  0x3a   :  { %361 = vmatpush1.bf16.msra.mxu0 %v695_v35 }
  0x3b   :  { %482 = vmatpush1.bf16.msra.mxu1 %v696_v36  ;;  %362 = vmatprep.subr.bf16.mxu0 %v707_v0 }
  0x3c   :  { %483 = vmatprep.subr.bf16.mxu1 %v707_v0 }
  0x3e   :  { %363 = vmatpush1.bf16.msra.mxu0 %v697_v37 }
  0x3f   :  { %484 = vmatpush1.bf16.msra.mxu1 %v698_v38  ;;  %364 = vmatprep.subr.bf16.mxu0 %v707_v0 }
  0x40   :  { %485 = vmatprep.subr.bf16.mxu1 %v707_v0 }
  0x42   :  { %365 = vmatpush1.bf16.msra.mxu0 %v699_v39 }
  0x43   :  { %486 = vmatpush1.bf16.msra.mxu1 %v700_v40  ;;  %366 = vmatprep.subr.bf16.mxu0 %v707_v0 }
  0x44   :  { %487 = vmatprep.subr.bf16.mxu1 %v707_v0 }
  0x46   :  { %367 = vmatpush1.bf16.msra.mxu0 %v701_v41 }
  0x47   :  { %488 = vmatpush1.bf16.msra.mxu1 %v702_v42  ;;  %368 = vmatprep.subr.bf16.mxu0 %v707_v0 }
  0x48   :  { %489 = vmatprep.subr.bf16.mxu1 %v707_v0 }
  0x4a   :  { %369 = vmatpush1.bf16.msra.mxu0 %v703_v43 }
  0x4b   :  { %490 = vmatpush1.bf16.msra.mxu1 %v704_v44  ;;  %370 = vmatprep.subr.bf16.mxu0 %v707_v0 }
  0x4c   :  { %491 = vmatprep.subr.bf16.mxu1 %v707_v0 }
  0x4e   :  { %371 = vmatpush1.bf16.msra.mxu0 %v350_v47 }
  0x4f   :  { %492 = vmatpush1.bf16.msra.mxu1 %v471_v48 }
  0x51   :  { %385 = vmatmul.mubr.bf16.vlgmr.msra.gmra.mrb[4].mxu0 %v819_v24 }
  0x52   :  { %506 = vmatmul.mubr.bf16.vlgmr.msra.gmra.mrb[4].mxu1 %v819_v24 }
  0x8b   :  { %v525_v59 = vpop.permute.xlu0 %524 }
  0x8f   :  { %v530_v9 = vpop.permute.xlu0 %529 }
  0xfc   :  { %v144_v49 = vpop.f32.mrb[0].mxu0 }
  0xfd   :  { %v265_v50 = vpop.f32.mrb[0].mxu1  ;;  %v146_v51 = vpop.f32.mrb[1].mxu0 }
  0xfe   :  { %v514_v52 = vmax.f32 %v144_v49, %v265_v50  ;;  %v267_v53 = vpop.f32.mrb[1].mxu1  ;;  %v147_v54 = vpop.f32.mrb[2].mxu0 }
  0xff   :  { %v268_v55 = vpop.f32.mrb[2].mxu1  ;;  %v149_v56 = vpop.f32.mrb[3].mxu0 }
 0x100   :  { %v515_v57 = vmax.f32 %v147_v54, %v268_v55  ;;  %v270_v58 = vpop.f32.mrb[3].mxu1 }
 0x124   :  { %v386_v60 = vpop.f32.mrb[4].mxu0 }
 0x125   :  { %v507_v61 = vpop.f32.mrb[4].mxu1  ;;  %v388_v62 = vpop.f32.mrb[5].mxu0 }
 0x126   :  { %v516_v63 = vmax.f32 %v386_v60, %v507_v61  ;;  %v509_v0 = vpop.f32.mrb[5].mxu1  ;;  %v389_v1 = vpop.f32.mrb[6].mxu0 }
 0x127   :  { %v510_v2 = vpop.f32.mrb[6].mxu1  ;;  %v391_v3 = vpop.f32.mrb[7].mxu0 }
 0x128   :  { %v518_v4 = vmax.f32 %v514_v52, %v516_v63  ;;  %v517_v5 = vmax.f32 %v389_v1, %v510_v2  ;;  %v512_v6 = vpop.f32.mrb[7].mxu1 }
 0x12a   :  { %v532_v7 = vadd.f32 %v525_v59, %v518_v4  ;;  %v519_v8 = vmax.f32 %v515_v57, %v517_v5 }
 0x12c   :  { %v533_v10 = vadd.f32 %v530_v9, %v519_v8  ;;  %v534_v11 = vmax.f32 %v532_v7, 0.0 }
 0x12e   :  { %v535_v12 = vmax.f32 %v533_v10, 0.0 }
 0x130   :  { %v660_v13 = vpack.c.bf16 %v535_v12, %v534_v11 }
 0x132   :  { %661 = vst [vmem:[%s921_s3] sm:$0xff] %v660_v13  }

// kernel: lenet_forward.5
= control target key start
LH: loop header
LB: loop body
LE: loop exit
PB: predicated region body
PF: predicated region fallthrough
CT: control target
= control target key end

     0   :  { %v875_v34 = vmov 0.0   ;;  %vm876_vm0 = vmmov 0   ;;  %s1106_s1 = inlined_call_operand.vmem [shape: bf16[512,128], index: 1, kind: input, shape index: {}]   ;;  %s1107_s0 = inlined_call_operand.vmem [shape: bf16[16,512], index: 0, kind: input, shape index: {}]   ;;  %s1108_s3 = inlined_call_operand.vmem [shape: bf16[128,128], index: 3, kind: input, shape index: {}]   ;;  %s1109_s5 = inlined_call_operand.vmem [shape: bf16[128,128], index: 5, kind: input, shape index: {}]   ;;  %s1110_s2 = inlined_call_operand.vmem [shape: f32[1,128], index: 2, kind: input, shape index: {}]   ;;  %s1111_s4 = inlined_call_operand.vmem [shape: f32[1,128], index: 4, kind: input, shape index: {}]   ;;  %s1112_s6 = inlined_call_operand.vmem [shape: f32[1,128], index: 6, kind: input, shape index: {}]   ;;  %s1113_s7 = inlined_call_operand.vmem [shape: f32[16,128], index: 7, kind: output, shape index: {}]  }
   0x1   :  { %v813_v0 = vld [vmem:[%s1106_s1 + $0x40] sm:$0xff]   ;;  %v817_v4 = vld [vmem:[%s1106_s1 + $0x48] sm:$0xff]   ;;  %v821_v8 = vld [vmem:[%s1106_s1 + $0x50] sm:$0xff]  }
   0x2   :  { %v814_v1 = vld [vmem:[%s1106_s1 + $0xc0] sm:$0xff]   ;;  %709 = vmatprep.subr.bf16.mxu0 %v813_v0  ;;  %v818_v5 = vld [vmem:[%s1106_s1 + $0xc8] sm:$0xff]   ;;  %v822_v9 = vld [vmem:[%s1106_s1 + $0xd0] sm:$0xff]  }
   0x3   :  { %v815_v2 = vld [vmem:[%s1106_s1] sm:$0xff]   ;;  %731 = vmatprep.subr.bf16.mxu1 %v814_v1  ;;  %v819_v6 = vld [vmem:[%s1106_s1 + $0x8] sm:$0xff]   ;;  %v823_v10 = vld [vmem:[%s1106_s1 + $0x10] sm:$0xff]  }
   0x4   :  { %v816_v3 = vld [vmem:[%s1106_s1 + $0x80] sm:$0xff]   ;;  %710 = vmatpush3.bf16.msra.mxu0 %v815_v2  ;;  %v820_v7 = vld [vmem:[%s1106_s1 + $0x88] sm:$0xff]   ;;  %v824_v11 = vld [vmem:[%s1106_s1 + $0x90] sm:$0xff]  }
   0x5   :  { %732 = vmatpush3.bf16.msra.mxu1 %v816_v3  ;;  %711 = vmatprep.subr.bf16.mxu0 %v817_v4  ;;  %v825_v12 = vld [vmem:[%s1106_s1 + $0x58] sm:$0xff]   ;;  %v829_v16 = vld [vmem:[%s1106_s1 + $0x60] sm:$0xff]   ;;  %v833_v20 = vld [vmem:[%s1106_s1 + $0x68] sm:$0xff]  }
   0x6   :  { %733 = vmatprep.subr.bf16.mxu1 %v818_v5  ;;  %v826_v13 = vld [vmem:[%s1106_s1 + $0xd8] sm:$0xff]   ;;  %v830_v17 = vld [vmem:[%s1106_s1 + $0xe0] sm:$0xff]   ;;  %v834_v21 = vld [vmem:[%s1106_s1 + $0xe8] sm:$0xff]  }
   0x7   :  { %v827_v14 = vld [vmem:[%s1106_s1 + $0x18] sm:$0xff]   ;;  %v831_v18 = vld [vmem:[%s1106_s1 + $0x20] sm:$0xff]   ;;  %v835_v22 = vld [vmem:[%s1106_s1 + $0x28] sm:$0xff]  }
   0x8   :  { %712 = vmatpush3.bf16.msra.mxu0 %v819_v6  ;;  %v828_v15 = vld [vmem:[%s1106_s1 + $0x98] sm:$0xff]   ;;  %v832_v19 = vld [vmem:[%s1106_s1 + $0xa0] sm:$0xff]   ;;  %v836_v23 = vld [vmem:[%s1106_s1 + $0xa8] sm:$0xff]  }
   0x9   :  { %734 = vmatpush3.bf16.msra.mxu1 %v820_v7  ;;  %713 = vmatprep.subr.bf16.mxu0 %v821_v8  ;;  %v837_v24 = vld [vmem:[%s1106_s1 + $0x70] sm:$0xff]   ;;  %v841_v28 = vld [vmem:[%s1106_s1 + $0x78] sm:$0xff]   ;;  %v851_v37 = vld [vmem:[%s1108_s3] sm:$0xff]  }
   0xa   :  { %735 = vmatprep.subr.bf16.mxu1 %v822_v9  ;;  %v838_v25 = vld [vmem:[%s1106_s1 + $0xf0] sm:$0xff]   ;;  %v842_v29 = vld [vmem:[%s1106_s1 + $0xf8] sm:$0xff]   ;;  %v852_v38 = vld [vmem:[%s1108_s3 + $0x8] sm:$0xff]  }
   0xb   :  { %v839_v26 = vld [vmem:[%s1106_s1 + $0x30] sm:$0xff]   ;;  %v843_v30 = vld [vmem:[%s1106_s1 + $0x38] sm:$0xff]   ;;  %v855_v41 = vld [vmem:[%s1108_s3 + $0x20] sm:$0xff]  }
   0xc   :  { %714 = vmatpush3.bf16.msra.mxu0 %v823_v10  ;;  %v840_v27 = vld [vmem:[%s1106_s1 + $0xb0] sm:$0xff]   ;;  %v844_v31 = vld [vmem:[%s1106_s1 + $0xb8] sm:$0xff]   ;;  %v856_v42 = vld [vmem:[%s1108_s3 + $0x28] sm:$0xff]  }
   0xd   :  { %736 = vmatpush3.bf16.msra.mxu1 %v824_v11  ;;  %715 = vmatprep.subr.bf16.mxu0 %v825_v12  ;;  %v845_v32 = vld [vmem:[%s1107_s0] ss:$16 sps:$4 sm:$0xff]   ;;  %v847_v33 = vld [vmem:[%s1107_s0 + $0x4] ss:$16 sps:$4 sm:$0xff]   ;;  %v848_v35 = vld [vmem:[%s1107_s0 + $0x8] ss:$16 sps:$4 sm:$0xff]  }
   0xe   :  { %737 = vmatprep.subr.bf16.mxu1 %v826_v13  ;;  %v850_v36 = vld [vmem:[%s1107_s0 + $0xc] ss:$16 sps:$4 sm:$0xff]   ;;  %346 = vmatprep.mubr.bf16.mxu0 %v847_v33  ;;  %v853_v39 = vld [vmem:[%s1108_s3 + $0x10] sm:$0xff]   ;;  %v859_v45 = vld [vmem:[%s1109_s5] sm:$0xff]  }
   0xf   :  { %387 = vmatprep.mubr.bf16.mxu1 %v850_v36  ;;  %v854_v40 = vld [vmem:[%s1108_s3 + $0x18] sm:$0xff]   ;;  %v857_v43 = vld [vmem:[%s1108_s3 + $0x30] sm:$0xff]   ;;  %v860_v46 = vld [vmem:[%s1109_s5 + $0x8] sm:$0xff]  }
  0x10   :  { %716 = vmatpush3.bf16.msra.mxu0 %v827_v14  ;;  %v858_v44 = vld [vmem:[%s1108_s3 + $0x38] sm:$0xff]   ;;  %v861_v47 = vld [vmem:[%s1109_s5 + $0x10] sm:$0xff]   ;;  %v863_v49 = vld [vmem:[%s1109_s5 + $0x20] sm:$0xff]  }
  0x11   :  { %738 = vmatpush3.bf16.msra.mxu1 %v828_v15  ;;  %717 = vmatprep.subr.bf16.mxu0 %v829_v16  ;;  %v862_v48 = vld [vmem:[%s1109_s5 + $0x18] sm:$0xff]   ;;  %v864_v50 = vld [vmem:[%s1109_s5 + $0x28] sm:$0xff]   ;;  %v654_v53 = vld [vmem:[%s1110_s2] ss:$0 sm:$0xff] }
  0x12   :  { %739 = vmatprep.subr.bf16.mxu1 %v830_v17  ;;  %v865_v7 = vld [vmem:[%s1109_s5 + $0x30] sm:$0xff]   ;;  %v866_v8 = vld [vmem:[%s1109_s5 + $0x38] sm:$0xff]   ;;  %v691_v9 = vld [vmem:[%s1111_s4] ss:$0 sm:$0xff] }
  0x14   :  { %718 = vmatpush3.bf16.msra.mxu0 %v831_v18 }
  0x15   :  { %740 = vmatpush3.bf16.msra.mxu1 %v832_v19  ;;  %719 = vmatprep.subr.bf16.mxu0 %v833_v20  ;;  %v700_v19 = vld [vmem:[%s1112_s6] ss:$0 sm:$0xff] }
  0x16   :  { %741 = vmatprep.subr.bf16.mxu1 %v834_v21 }
  0x18   :  { %720 = vmatpush3.bf16.msra.mxu0 %v835_v22 }
  0x19   :  { %742 = vmatpush3.bf16.msra.mxu1 %v836_v23  ;;  %721 = vmatprep.subr.bf16.mxu0 %v837_v24 }
  0x1a   :  { %743 = vmatprep.subr.bf16.mxu1 %v838_v25 }
  0x1c   :  { %722 = vmatpush3.bf16.msra.mxu0 %v839_v26 }
  0x1d   :  { %744 = vmatpush3.bf16.msra.mxu1 %v840_v27  ;;  %723 = vmatprep.subr.bf16.mxu0 %v841_v28 }
  0x1e   :  { %745 = vmatprep.subr.bf16.mxu1 %v842_v29 }
  0x20   :  { %724 = vmatpush3.bf16.msra.mxu0 %v843_v30 }
  0x21   :  { %746 = vmatpush3.bf16.msra.mxu1 %v844_v31  ;;  %771 = vmatprep.subr.bf16.mxu0 %v875_v34 }
  0x22   :  { %791 = vmatprep.subr.bf16.mxu1 %v875_v34 }
  0x23   :  { %347 = vmatmul.mubr.bf16.vlgmr.msra.gmra.mrb[0].mxu0 %v845_v32 }
  0x24   :  { %388 = vmatmul.mubr.bf16.vlgmr.msra.gmra.mrb[0].mxu1 %v848_v35  ;;  %772 = vmatpush3.bf16.msra.mxu0 %v851_v37 }
  0x25   :  { %773 = vmatprep.subr.bf16.mxu0 %v875_v34  ;;  %787 = vmatprep.mubr.msk.bf16.mxu0 %vm876_vm0, %v875_v34 }
  0x26   :  { %807 = vmatprep.mubr.msk.bf16.mxu1 %vm876_vm0, %v875_v34  ;;  %792 = vmatpush3.bf16.msra.mxu1 %v859_v45 }
  0x27   :  { %793 = vmatprep.subr.bf16.mxu1 %v875_v34 }
  0x28   :  { %774 = vmatpush3.bf16.msra.mxu0 %v852_v38 }
  0x29   :  { %775 = vmatprep.subr.bf16.mxu0 %v875_v34 }
  0x2a   :  { %794 = vmatpush3.bf16.msra.mxu1 %v860_v46 }
  0x2b   :  { %795 = vmatprep.subr.bf16.mxu1 %v875_v34 }
  0x2c   :  { %776 = vmatpush3.bf16.msra.mxu0 %v853_v39 }
  0x2d   :  { %777 = vmatprep.subr.bf16.mxu0 %v875_v34 }
  0x2e   :  { %796 = vmatpush3.bf16.msra.mxu1 %v861_v47 }
  0x2f   :  { %797 = vmatprep.subr.bf16.mxu1 %v875_v34 }
  0x30   :  { %778 = vmatpush3.bf16.msra.mxu0 %v854_v40 }
  0x31   :  { %779 = vmatprep.subr.bf16.mxu0 %v875_v34 }
  0x32   :  { %798 = vmatpush3.bf16.msra.mxu1 %v862_v48 }
  0x33   :  { %799 = vmatprep.subr.bf16.mxu1 %v875_v34 }
  0x34   :  { %780 = vmatpush3.bf16.msra.mxu0 %v855_v41 }
  0x35   :  { %781 = vmatprep.subr.bf16.mxu0 %v875_v34 }
  0x36   :  { %800 = vmatpush3.bf16.msra.mxu1 %v863_v49 }
  0x37   :  { %801 = vmatprep.subr.bf16.mxu1 %v875_v34 }
  0x38   :  { %782 = vmatpush3.bf16.msra.mxu0 %v856_v42 }
  0x39   :  { %783 = vmatprep.subr.bf16.mxu0 %v875_v34 }
  0x3a   :  { %802 = vmatpush3.bf16.msra.mxu1 %v864_v50 }
  0x3b   :  { %803 = vmatprep.subr.bf16.mxu1 %v875_v34 }
  0x3c   :  { %784 = vmatpush3.bf16.msra.mxu0 %v857_v43 }
  0x3d   :  { %785 = vmatprep.subr.bf16.mxu0 %v875_v34 }
  0x3e   :  { %804 = vmatpush3.bf16.msra.mxu1 %v865_v7 }
  0x3f   :  { %805 = vmatprep.subr.bf16.mxu1 %v875_v34 }
  0x40   :  { %786 = vmatpush3.bf16.msra.mxu0 %v858_v44 }
  0x42   :  { %806 = vmatpush3.bf16.msra.mxu1 %v866_v8 }
  0xf6   :  { %v725_v51 = vpop.f32.mrb[0].mxu0 }
  0xf7   :  { %v747_v52 = vpop.f32.mrb[0].mxu1  ;;  %v726_v54 = vpop.f32.mrb[1].mxu0 }
  0xf8   :  { %v727_v55 = vadd.f32 %v726_v54, %v725_v51  ;;  %v748_v56 = vpop.f32.mrb[1].mxu1  ;;  %v728_v57 = vpop.f32.mrb[2].mxu0 }
  0xf9   :  { %v749_v58 = vadd.f32 %v748_v56, %v747_v52  ;;  %v750_v59 = vpop.f32.mrb[2].mxu1  ;;  %v729_v60 = vpop.f32.mrb[3].mxu0 }
  0xfa   :  { %v349_v61 = vadd.f32 %v727_v55, %v654_v53  ;;  %v730_v62 = vadd.f32 %v729_v60, %v728_v57  ;;  %v751_v63 = vpop.f32.mrb[3].mxu1 }
  0xfb   :  { %v752_v0 = vadd.f32 %v751_v63, %v750_v59 }
  0xfc   :  { %v390_v1 = vadd.f32 %v749_v58, %v349_v61  ;;  %v352_v2 = vadd.f32 %v730_v62, %v654_v53 }
  0xfe   :  { %v393_v3 = vadd.f32 %v752_v0, %v352_v2  ;;  %v396_v4 = vmax.f32 %v390_v1, 0.0 }
 0x100   :  { %v397_v5 = vmax.f32 %v393_v3, 0.0 }
 0x102   :  { %v398_v6 = vpack.c.bf16 %v397_v5, %v396_v4 }
 0x104   :  { %788 = vmatmul.mubr.bf16.vlgmr.msra.gmra.mrb[4].mxu0 %v398_v6 }
 0x1d7   :  { %v504_v10 = vpop.f32.mrb[4].mxu0 }
 0x1d8   :  { %v505_v11 = vadd.f32 %v691_v9, %v504_v10  ;;  %v789_v12 = vpop.f32.mrb[5].mxu0 }
 0x1d9   :  { %v507_v13 = vpop.f32.mrb[6].mxu0 }
 0x1da   :  { %v508_v14 = vadd.f32 %v691_v9, %v507_v13  ;;  %v790_v15 = vpop.f32.mrb[7].mxu0  ;;  %v511_v16 = vmax.f32 %v505_v11, 0.0 }
 0x1dc   :  { %v512_v17 = vmax.f32 %v508_v14, 0.0 }
 0x1de   :  { %v513_v18 = vpack.c.bf16 %v512_v17, %v511_v16 }
 0x1e0   :  { %808 = vmatmul.mubr.bf16.vlgmr.msra.gmra.mrb[4].mxu1 %v513_v18 }
 0x2b3   :  { %v619_v20 = vpop.f32.mrb[4].mxu1 }
 0x2b4   :  { %v620_v21 = vadd.f32 %v700_v19, %v619_v20  ;;  %v809_v22 = vpop.f32.mrb[5].mxu1 }
 0x2b5   :  { %v622_v23 = vpop.f32.mrb[6].mxu1 }
 0x2b6   :  { %626 = vmax.xlane.f32.xlu0 %v620_v21  ;;  %v810_v24 = vpop.f32.mrb[7].mxu1  ;;  %v623_v25 = vadd.f32 %v700_v19, %v622_v23 }
 0x2ba   :  { %628 = vmax.xlane.f32.xlu0 %v623_v25 }
 0x343   :  { %v627_v26 = vpop.xlane.xlu0 %626 }
 0x344   :  { %v630_v27 = vsub.f32 %v620_v21, %v627_v26 }
 0x346   :  { %v632_v28 = vmul.f32 1.442695, %v630_v27 }
 0x347   :  { %v629_v29 = vpop.xlane.xlu0 %628 }
 0x348   :  { %v631_v30 = vsub.f32 %v623_v25, %v629_v29  ;;  %867 = vpow2.f32 %v632_v28 }
 0x34a   :  { %v634_v31 = vmul.f32 1.442695, %v631_v30 }
 0x34c   :  { %869 = vpow2.f32 %v634_v31 }
 0x352   :  { %v868_v32 = vpop.eup %867 }
 0x353   :  { %636 = vadd.xlane.f32.xlu1 %v868_v32 }
 0x356   :  { %v870_v33 = vpop.eup %869 }
 0x357   :  { %638 = vadd.xlane.f32.xlu1 %v870_v33 }
 0x3e0   :  { %v637_v34 = vpop.xlane.xlu1 %636 }
 0x3e1   :  { %871 = vlog2.f32 %v637_v34 }
 0x3e4   :  { %v639_v35 = vpop.xlane.xlu1 %638 }
 0x3e5   :  { %873 = vlog2.f32 %v639_v35 }
 0x3eb   :  { %v872_v36 = vpop.eup %871 }
 0x3ec   :  { %v641_v37 = vmul.f32 0.6931472, %v872_v36 }
 0x3ee   :  { %v644_v38 = vadd.f32 %v641_v37, %v627_v26 }
 0x3ef   :  { %v874_v39 = vpop.eup %873 }
 0x3f0   :  { %v646_v40 = vsub.f32 %v620_v21, %v644_v38  ;;  %v643_v41 = vmul.f32 0.6931472, %v874_v39 }
 0x3f2   :  { %648 = vst [vmem:[%s1113_s7] sm:$0xff] %v646_v40  ;;  %v645_v42 = vadd.f32 %v643_v41, %v629_v29 }
 0x3f4   :  { %v647_v43 = vsub.f32 %v623_v25, %v645_v42 }
 0x3f6   :  { %649 = vst [vmem:[%s1113_s7 + $0x8] sm:$0xff] %v647_v43 }

</bundles_post_ra>
